<compile_context>
chip_gen: v7x
topology: tpu7x:2x2x1
jax: 0.10.0
libtpu: 0.0.40
codegen_flags: <defaults>
</compile_context>

<pallas_src>
import functools
import math

import jax
import jax.numpy as jnp
from jax import lax
from jax.experimental import pallas as pl
from jax.experimental.pallas import tpu as pltpu

HIDDEN_SIZE = 128
INPUT_SIZE = 28
NUM_CLASSES = 10
NUM_LAYERS = 2      # kernel hard-codes 2 layers, matching the module's config
LANE = 128
SUBLANE_BF16 = 16   # bf16 packs 16 sublanes per vreg


def _round_up(x, m):
    return (x + m - 1) // m * m


def _cdiv(a, b):
    return -(-a // b)


def rnn_wavefront_kernel(xw0_ref,    # (TC, TB, H)  bf16: chunk of x@Wih0 + b0, time-major
                         wblk_ref,   # (2H, 2H)     bf16: [[Whh0, Wih1], [0, Whh1]]
                         b1_ref,     # (1, H)       f32 : b_ih1 + b_hh1
                         fcw_ref,    # (H, Cp)      bf16 (zero-padded lanes)
                         fcb_ref,    # (1, Cp)      f32  (zero-padded lanes)
                         out_ref,    # (TB, Cp)     f32
                         carry_ref,  # scratch (TB, H) f32 : h0(t)@Whh0 across chunks
                         h1_ref,     # scratch (TB, H) bf16: h1(t)      across chunks
                         *, T, TC, needs_mask, unroll):
    c = pl.program_id(1)                 # time-chunk index ("arbitrary" axis, innermost)
    last_chunk = c == pl.num_programs(1) - 1

    TB = carry_ref.shape[0]
    H = b1_ref.shape[1]

    # h_0 = 0 (PyTorch default): zero the cross-chunk state at the first chunk of each
    # batch block (batch blocks iterate on the outer, "parallel" grid axis).
    @pl.when(c == 0)
    def _():
        carry_ref[...] = jnp.zeros_like(carry_ref)
        h1_ref[...] = jnp.zeros_like(h1_ref)

    # Hoisted bias broadcast (computed once per chunk, reused by every step).
    b1b = jnp.broadcast_to(b1_ref[...], (TB, H))

    # Loop-carried state lives in vregs: no per-step VMEM round trips on the serial chain.
    carry0 = carry_ref[...]               # (TB, H) f32
    h1_0 = h1_ref[...]                    # (TB, H) bf16

    def step(t, state):
        carry, h1 = state
        # layer 0: pre = (x(t)@Wih0 + b0)  +  h0(t-1)@Whh0 (carried from previous step)
        h0 = jnp.tanh(xw0_ref[t].astype(jnp.float32) + carry)          # (TB, H) f32
        # single fused MXU op: [h0(t), h1(t-1)] @ [[Whh0, Wih1], [0, Whh1]]
        hcat = jnp.concatenate([h0.astype(jnp.bfloat16), h1], axis=-1)  # (TB, 2H) bf16
        z = jnp.dot(hcat, wblk_ref[...],
                    preferred_element_type=jnp.float32)                # (TB, 2H) f32
        new_carry = z[:, 0:H]                                          # h0(t)@Whh0
        new_h1 = jnp.tanh(z[:, H:2 * H] + b1b).astype(jnp.bfloat16)    # h1(t)
        if needs_mask:
            # Ragged last chunk: freeze the state on padded time steps.
            valid = (c * TC + t) < T
            new_carry = jnp.where(valid, new_carry, carry)
            new_h1 = jnp.where(valid, new_h1, h1)
        return new_carry, new_h1

    carry, h1 = lax.fori_loop(0, TC, step, (carry0, h1_0), unroll=unroll)

    # Persist state across time chunks (skipped on the last chunk).
    @pl.when(jnp.logical_not(last_chunk))
    def _():
        carry_ref[...] = carry
        h1_ref[...] = h1

    # fc head on the final top-layer hidden state h1(T-1); bf16 matmul, lane-dense store.
    @pl.when(last_chunk)
    def _():
        out_ref[...] = (jnp.dot(h1, fcw_ref[...], preferred_element_type=jnp.float32)
                        + fcb_ref[...])


def _vmem_cap_bytes():
    try:
        return int(pltpu.get_tpu_info().vmem_capacity_bytes)
    except Exception:
        return 64 * 1024 * 1024  # conservative fallback: smallest physical VMEM (v7x)


def base_rnn_forward(x, kparams):
    """x: (B, T, INPUT_SIZE) float32 (batch_first). Returns (B, NUM_CLASSES) float32."""
    B, T, Din = x.shape
    assert Din == INPUT_SIZE
    H = HIDDEN_SIZE
    Cp = kparams["fcw"].shape[1]

    # Batch tiling: multiple of 16 sublanes (full bf16 vregs); at least 2 blocks whenever
    # B > 16 so the "parallel" batch axis can shard across both TensorCores on v7x.
    B16 = _round_up(B, SUBLANE_BF16)
    TB = min(LANE, _round_up(_cdiv(B16, 2), SUBLANE_BF16))
    Bp = _round_up(B, TB)
    nb = Bp // TB
    if Bp != B:
        x = jnp.pad(x, ((0, Bp - B), (0, 0), (0, 0)))

    # Time chunking: bounds VMEM independently of T; state persists in scratch across chunks.
    TC = min(T, 64)
    n_chunks = _cdiv(T, TC)
    Tp = n_chunks * TC

    # Hoisted input projection: one big well-shaped matmul; fuses the batch_first ->
    # time-major transpose and b0.  Stored in bf16 to halve the HBM->VMEM traffic.
    xw0 = (jnp.einsum("btd,dh->tbh", x, kparams["wih0"],
                      preferred_element_type=jnp.float32)
           + kparams["b0"]).astype(jnp.bfloat16)                        # (T, Bp, H)
    if Tp != T:
        xw0 = jnp.pad(xw0, ((0, Tp - T), (0, 0), (0, 0)))

    # Unroll matched to register budget (state + z + hcat temporaries vs. 64-vreg file).
    if TC <= 16:
        unroll = True
    elif TB >= 128:
        unroll = 2
    else:
        unroll = 4

    kernel = functools.partial(rnn_wavefront_kernel,
                               T=T, TC=TC, needs_mask=(Tp != T), unroll=unroll)

    # Explicit VMEM budget with headroom; never above 3/4 of physical VMEM (v7x = 64 MiB).
    block_bytes = (2 * TC * TB * H * 2                 # xw0 chunk (bf16), double-buffered
                   + 2 * (2 * H) * (2 * H) * 2         # wblk (bf16)
                   + 2 * (H * Cp * 2)                  # fcw (bf16)
                   + 2 * (Cp * 4 + H * 4)              # fcb + b1 (f32)
                   + 2 * TB * Cp * 4                   # out block (f32)
                   + TB * H * 4 + TB * H * 2)          # scratch: carry f32 + h1 bf16
    vmem_limit = int(min(max(2 * block_bytes, 16 * 1024 * 1024),
                         (_vmem_cap_bytes() * 3) // 4))

    out = pl.pallas_call(
        kernel,
        out_shape=jax.ShapeDtypeStruct((Bp, Cp), jnp.float32),
        grid=(nb, n_chunks),
        in_specs=[
            pl.BlockSpec((TC, TB, H), lambda b, c: (c, b, 0)),
            pl.BlockSpec((2 * H, 2 * H), lambda b, c: (0, 0)),
            pl.BlockSpec((1, H), lambda b, c: (0, 0)),
            pl.BlockSpec((H, Cp), lambda b, c: (0, 0)),
            pl.BlockSpec((1, Cp), lambda b, c: (0, 0)),
        ],
        out_specs=pl.BlockSpec((TB, Cp), lambda b, c: (b, 0)),
        scratch_shapes=[
            pltpu.VMEM((TB, H), jnp.float32),
            pltpu.VMEM((TB, H), jnp.bfloat16),
        ],
        compiler_params=pltpu.CompilerParams(
            dimension_semantics=("parallel", "arbitrary"),
            vmem_limit_bytes=vmem_limit,
        ),
    )(xw0, kparams["wblk"], kparams["b1"], kparams["fcw"], kparams["fcb"])

    return out[:B, :NUM_CLASSES]


def init_params(key):
    """Raw f32 params matching reset_parameters(): uniform(-stdv, stdv), stdv=1/sqrt(H).
    Weights are kept in the transposed (in_features, out_features) layout."""
    stdv = 1.0 / math.sqrt(HIDDEN_SIZE)
    H, Din, C = HIDDEN_SIZE, INPUT_SIZE, NUM_CLASSES
    ks = jax.random.split(key, 10)

    def u(k, shape):
        return jax.random.uniform(k, shape, jnp.float32, minval=-stdv, maxval=stdv)

    wih0 = u(ks[0], (Din, H))
    whh0 = u(ks[1], (H, H))
    b_ih0 = u(ks[2], (H,))
    b_hh0 = u(ks[3], (H,))
    wih1 = u(ks[4], (H, H))
    whh1 = u(ks[5], (H, H))
    b_ih1 = u(ks[6], (H,))
    b_hh1 = u(ks[7], (H,))
    fcw = u(ks[8], (H, C))
    fcb = u(ks[9], (C,))

    return {
        "wih0": wih0, "whh0": whh0, "b0": (b_ih0 + b_hh0).reshape(1, H),
        "wih1": wih1, "whh1": whh1, "b1": (b_ih1 + b_hh1).reshape(1, H),
        "fcw": fcw, "fcb": fcb.reshape(1, C),
    }


def pack_kernel_params(p):
    """Build the fused / padded / cast parameter set the kernel consumes."""
    H, C = HIDDEN_SIZE, NUM_CLASSES
    Cp = LANE  # pad FC output to a full 128-lane register for lane-dense stores
    # Wavefront block weight [[Whh0, Wih1], [0, Whh1]].  The zero block must stay exactly
    # zero so h1 never leaks into layer-0's recurrent term (0 is exact in bf16).
    wblk = jnp.concatenate(
        [jnp.concatenate([p["whh0"], p["wih1"]], axis=1),
         jnp.concatenate([jnp.zeros((H, H), jnp.float32), p["whh1"]], axis=1)],
        axis=0).astype(jnp.bfloat16)
    fcw = jnp.zeros((H, Cp), jnp.float32).at[:, :C].set(p["fcw"]).astype(jnp.bfloat16)
    fcb = jnp.zeros((1, Cp), jnp.float32).at[:, :C].set(p["fcb"])
    return {"wih0": p["wih0"], "b0": p["b0"], "wblk": wblk,
            "b1": p["b1"], "fcw": fcw, "fcb": fcb}


def reference_forward(x, p):
    """Pure-JAX f32 reference of the PyTorch forward pass (for sanity check)."""
    B, T, _ = x.shape
    h0 = jnp.zeros((B, HIDDEN_SIZE), jnp.float32)
    h1 = jnp.zeros((B, HIDDEN_SIZE), jnp.float32)
    for t in range(T):
        x_t = x[:, t, :]
        h0 = jnp.tanh(x_t @ p["wih0"] + h0 @ p["whh0"] + p["b0"])
        h1 = jnp.tanh(h0 @ p["wih1"] + h1 @ p["whh1"] + p["b1"])
    return h1 @ p["fcw"] + p["fcb"]


if __name__ == "__main__":
    key = jax.random.PRNGKey(0)
    k_param, k_x = jax.random.split(key)

    B, T = 2, 8  # small batch / sequence length; feature dim fixed by the module (28)
    raw_params = init_params(k_param)
    kparams = pack_kernel_params(raw_params)
    x = jax.random.normal(k_x, (B, T, INPUT_SIZE), jnp.float32)

    out = base_rnn_forward(x, kparams)
    out = jax.block_until_ready(out)

    ref = reference_forward(x, raw_params)
    assert out.shape == (B, NUM_CLASSES)
    # Recurrence + input projection run in bf16 (f32 accumulation) -> loosened tolerance.
    assert jnp.allclose(out, ref, atol=2e-2, rtol=2e-2), "mismatch vs pure-JAX reference"

    print("KERNEL_OK")
</pallas_src>

<mosaic_0001>
module attributes {stable_mosaic.version = 11 : i64} {
  func.func @rnn_wavefront_kernel(%arg0: i32, %arg1: i32, %arg2: memref<8x16x128xbf16, #tpu.memory_space<vmem>>, %arg3: memref<256x256xbf16, #tpu.memory_space<vmem>>, %arg4: memref<1x128xf32, #tpu.memory_space<vmem>>, %arg5: memref<128x128xbf16, #tpu.memory_space<vmem>>, %arg6: memref<1x128xf32, #tpu.memory_space<vmem>>, %arg7: memref<16x128xf32, #tpu.memory_space<vmem>>, %arg8: memref<16x128xf32, #tpu.memory_space<vmem>>, %arg9: memref<16x128xbf16, #tpu.memory_space<vmem>>) attributes {dimension_semantics = [#tpu.dimension_semantics<parallel>, #tpu.dimension_semantics<arbitrary>], iteration_bounds = array<i64: 1, 1>, scalar_prefetch = 0 : i64, scratch_operands = 2 : i64, tpu.core_type = #tpu.core_type<tc>, window_params = [{transform_indices = @transform_0, window_bounds = array<i64: 8, 16, 128>}, {pipeline_mode = #tpu.pipeline_mode<synchronous>, transform_indices = @transform_1, window_bounds = array<i64: 256, 256>}, {pipeline_mode = #tpu.pipeline_mode<synchronous>, transform_indices = @transform_2, window_bounds = array<i64: 1, 128>}, {pipeline_mode = #tpu.pipeline_mode<synchronous>, transform_indices = @transform_3, window_bounds = array<i64: 128, 128>}, {pipeline_mode = #tpu.pipeline_mode<synchronous>, transform_indices = @transform_4, window_bounds = array<i64: 1, 128>}, {transform_indices = @transform_5, window_bounds = array<i64: 16, 128>}]} {
    %c0_i32 = arith.constant 0 : i32
    %0 = arith.cmpi eq, %arg1, %c0_i32 : i32
    %c0_i32_0 = arith.constant 0 : i32
    %1 = arith.cmpi eq, %arg1, %c0_i32_0 : i32
    %2 = arith.extui %1 : i1 to i32
    %c0_i32_1 = arith.constant 0 : i32
    %3 = arith.cmpi ne, %2, %c0_i32_1 : i32
    scf.if %3 {
      %cst_49 = arith.constant 0.000000e+00 : f32
      %134 = vector.broadcast %cst_49 : f32 to vector<16x128xf32>
      %c0_50 = arith.constant 0 : index
      %c0_51 = arith.constant 0 : index
      %135 = vector.load %arg8[%c0_50, %c0_51] : memref<16x128xf32, #tpu.memory_space<vmem>>, vector<16x128xf32>
      tpu.vector_store %arg8[%c0_50, %c0_51], %134 {strides = array<i32>} : memref<16x128xf32, #tpu.memory_space<vmem>>, vector<16x128xf32>,
      %cst_52 = arith.constant 0.000000e+00 : bf16
      %136 = vector.broadcast %cst_52 : bf16 to vector<16x128xbf16>
      %c0_53 = arith.constant 0 : index
      %c0_54 = arith.constant 0 : index
      %137 = vector.load %arg9[%c0_53, %c0_54] : memref<16x128xbf16, #tpu.memory_space<vmem>>, vector<16x128xbf16>
      tpu.vector_store %arg9[%c0_53, %c0_54], %136 {strides = array<i32>} : memref<16x128xbf16, #tpu.memory_space<vmem>>, vector<16x128xbf16>,
    } else {
    }
    %c0 = arith.constant 0 : index
    %c0_2 = arith.constant 0 : index
    %4 = vector.load %arg4[%c0, %c0_2] : memref<1x128xf32, #tpu.memory_space<vmem>>, vector<1x128xf32>
    %5 = vector.shape_cast %4 : vector<1x128xf32> to vector<1x128xf32>
    %6 = vector.broadcast %5 : vector<1x128xf32> to vector<16x128xf32>
    %c0_3 = arith.constant 0 : index
    %c0_4 = arith.constant 0 : index
    %7 = vector.load %arg8[%c0_3, %c0_4] : memref<16x128xf32, #tpu.memory_space<vmem>>, vector<16x128xf32>
    %c0_5 = arith.constant 0 : index
    %c0_6 = arith.constant 0 : index
    %8 = vector.load %arg9[%c0_5, %c0_6] : memref<16x128xbf16, #tpu.memory_space<vmem>>, vector<16x128xbf16>
    %c0_i32_7 = arith.constant 0 : i32
    %9 = arith.index_cast %c0_i32_7 : i32 to index
    %c0_8 = arith.constant 0 : index
    %c0_9 = arith.constant 0 : index
    %10 = vector.load %arg2[%9, %c0_8, %c0_9] : memref<8x16x128xbf16, #tpu.memory_space<vmem>>, vector<1x16x128xbf16>
    %11 = vector.shape_cast %10 : vector<1x16x128xbf16> to vector<16x128xbf16>
    %12 = arith.extf %11 : vector<16x128xbf16> to vector<16x128xf32>
    %13 = arith.addf %12, %7 : vector<16x128xf32>
    %14 = math.tanh %13 : vector<16x128xf32>
    %15 = arith.truncf %14 : vector<16x128xf32> to vector<16x128xbf16>
    %16 = tpu.concatenate %15, %8 in 1 : vector<16x128xbf16>, vector<16x128xbf16> -> vector<16x256xbf16>
    %c0_10 = arith.constant 0 : index
    %c0_11 = arith.constant 0 : index
    %17 = vector.load %arg3[%c0_10, %c0_11] : memref<256x256xbf16, #tpu.memory_space<vmem>>, vector<256x256xbf16>
    %cst = arith.constant dense<0.000000e+00> : vector<16x256xf32>
    %18 = tpu.matmul %16, %17, %cst {dimension_numbers = #tpu.dot_dimension_numbers<[1], [0], [0], [1], [0, 0, 1, 1], [], []>} : vector<16x256xbf16>, vector<256x256xbf16>, vector<16x256xf32> -> vector<16x256xf32>
    %19 = vector.extract_strided_slice %18 {offsets = [0, 0], sizes = [16, 128], strides = [1, 1]} : vector<16x256xf32> to vector<16x128xf32>
    %20 = vector.extract_strided_slice %18 {offsets = [0, 128], sizes = [16, 128], strides = [1, 1]} : vector<16x256xf32> to vector<16x128xf32>
    %21 = arith.addf %20, %6 : vector<16x128xf32>
    %22 = math.tanh %21 : vector<16x128xf32>
    %23 = arith.truncf %22 : vector<16x128xf32> to vector<16x128xbf16>
    %c1_i32 = arith.constant 1 : i32
    %24 = arith.index_cast %c1_i32 : i32 to index
    %c0_12 = arith.constant 0 : index
    %c0_13 = arith.constant 0 : index
    %25 = vector.load %arg2[%24, %c0_12, %c0_13] : memref<8x16x128xbf16, #tpu.memory_space<vmem>>, vector<1x16x128xbf16>
    %26 = vector.shape_cast %25 : vector<1x16x128xbf16> to vector<16x128xbf16>
    %27 = arith.extf %26 : vector<16x128xbf16> to vector<16x128xf32>
    %28 = arith.addf %27, %19 : vector<16x128xf32>
    %29 = math.tanh %28 : vector<16x128xf32>
    %30 = arith.truncf %29 : vector<16x128xf32> to vector<16x128xbf16>
    %31 = tpu.concatenate %30, %23 in 1 : vector<16x128xbf16>, vector<16x128xbf16> -> vector<16x256xbf16>
    %c0_14 = arith.constant 0 : index
    %c0_15 = arith.constant 0 : index
    %32 = vector.load %arg3[%c0_14, %c0_15] : memref<256x256xbf16, #tpu.memory_space<vmem>>, vector<256x256xbf16>
    %cst_16 = arith.constant dense<0.000000e+00> : vector<16x256xf32>
    %33 = tpu.matmul %31, %32, %cst_16 {dimension_numbers = #tpu.dot_dimension_numbers<[1], [0], [0], [1], [0, 0, 1, 1], [], []>} : vector<16x256xbf16>, vector<256x256xbf16>, vector<16x256xf32> -> vector<16x256xf32>
    %34 = vector.extract_strided_slice %33 {offsets = [0, 0], sizes = [16, 128], strides = [1, 1]} : vector<16x256xf32> to vector<16x128xf32>
    %35 = vector.extract_strided_slice %33 {offsets = [0, 128], sizes = [16, 128], strides = [1, 1]} : vector<16x256xf32> to vector<16x128xf32>
    %36 = arith.addf %35, %6 : vector<16x128xf32>
    %37 = math.tanh %36 : vector<16x128xf32>
    %38 = arith.truncf %37 : vector<16x128xf32> to vector<16x128xbf16>
    %c2_i32 = arith.constant 2 : i32
    %39 = arith.index_cast %c2_i32 : i32 to index
    %c0_17 = arith.constant 0 : index
    %c0_18 = arith.constant 0 : index
    %40 = vector.load %arg2[%39, %c0_17, %c0_18] : memref<8x16x128xbf16, #tpu.memory_space<vmem>>, vector<1x16x128xbf16>
    %41 = vector.shape_cast %40 : vector<1x16x128xbf16> to vector<16x128xbf16>
    %42 = arith.extf %41 : vector<16x128xbf16> to vector<16x128xf32>
    %43 = arith.addf %42, %34 : vector<16x128xf32>
    %44 = math.tanh %43 : vector<16x128xf32>
    %45 = arith.truncf %44 : vector<16x128xf32> to vector<16x128xbf16>
    %46 = tpu.concatenate %45, %38 in 1 : vector<16x128xbf16>, vector<16x128xbf16> -> vector<16x256xbf16>
    %c0_19 = arith.constant 0 : index
    %c0_20 = arith.constant 0 : index
    %47 = vector.load %arg3[%c0_19, %c0_20] : memref<256x256xbf16, #tpu.memory_space<vmem>>, vector<256x256xbf16>
    %cst_21 = arith.constant dense<0.000000e+00> : vector<16x256xf32>
    %48 = tpu.matmul %46, %47, %cst_21 {dimension_numbers = #tpu.dot_dimension_numbers<[1], [0], [0], [1], [0, 0, 1, 1], [], []>} : vector<16x256xbf16>, vector<256x256xbf16>, vector<16x256xf32> -> vector<16x256xf32>
    %49 = vector.extract_strided_slice %48 {offsets = [0, 0], sizes = [16, 128], strides = [1, 1]} : vector<16x256xf32> to vector<16x128xf32>
    %50 = vector.extract_strided_slice %48 {offsets = [0, 128], sizes = [16, 128], strides = [1, 1]} : vector<16x256xf32> to vector<16x128xf32>
    %51 = arith.addf %50, %6 : vector<16x128xf32>
    %52 = math.tanh %51 : vector<16x128xf32>
    %53 = arith.truncf %52 : vector<16x128xf32> to vector<16x128xbf16>
    %c3_i32 = arith.constant 3 : i32
    %54 = arith.index_cast %c3_i32 : i32 to index
    %c0_22 = arith.constant 0 : index
    %c0_23 = arith.constant 0 : index
    %55 = vector.load %arg2[%54, %c0_22, %c0_23] : memref<8x16x128xbf16, #tpu.memory_space<vmem>>, vector<1x16x128xbf16>
    %56 = vector.shape_cast %55 : vector<1x16x128xbf16> to vector<16x128xbf16>
    %57 = arith.extf %56 : vector<16x128xbf16> to vector<16x128xf32>
    %58 = arith.addf %57, %49 : vector<16x128xf32>
    %59 = math.tanh %58 : vector<16x128xf32>
    %60 = arith.truncf %59 : vector<16x128xf32> to vector<16x128xbf16>
    %61 = tpu.concatenate %60, %53 in 1 : vector<16x128xbf16>, vector<16x128xbf16> -> vector<16x256xbf16>
    %c0_24 = arith.constant 0 : index
    %c0_25 = arith.constant 0 : index
    %62 = vector.load %arg3[%c0_24, %c0_25] : memref<256x256xbf16, #tpu.memory_space<vmem>>, vector<256x256xbf16>
    %cst_26 = arith.constant dense<0.000000e+00> : vector<16x256xf32>
    %63 = tpu.matmul %61, %62, %cst_26 {dimension_numbers = #tpu.dot_dimension_numbers<[1], [0], [0], [1], [0, 0, 1, 1], [], []>} : vector<16x256xbf16>, vector<256x256xbf16>, vector<16x256xf32> -> vector<16x256xf32>
    %64 = vector.extract_strided_slice %63 {offsets = [0, 0], sizes = [16, 128], strides = [1, 1]} : vector<16x256xf32> to vector<16x128xf32>
    %65 = vector.extract_strided_slice %63 {offsets = [0, 128], sizes = [16, 128], strides = [1, 1]} : vector<16x256xf32> to vector<16x128xf32>
    %66 = arith.addf %65, %6 : vector<16x128xf32>
    %67 = math.tanh %66 : vector<16x128xf32>
    %68 = arith.truncf %67 : vector<16x128xf32> to vector<16x128xbf16>
    %c4_i32 = arith.constant 4 : i32
    %69 = arith.index_cast %c4_i32 : i32 to index
    %c0_27 = arith.constant 0 : index
    %c0_28 = arith.constant 0 : index
    %70 = vector.load %arg2[%69, %c0_27, %c0_28] : memref<8x16x128xbf16, #tpu.memory_space<vmem>>, vector<1x16x128xbf16>
    %71 = vector.shape_cast %70 : vector<1x16x128xbf16> to vector<16x128xbf16>
    %72 = arith.extf %71 : vector<16x128xbf16> to vector<16x128xf32>
    %73 = arith.addf %72, %64 : vector<16x128xf32>
    %74 = math.tanh %73 : vector<16x128xf32>
    %75 = arith.truncf %74 : vector<16x128xf32> to vector<16x128xbf16>
    %76 = tpu.concatenate %75, %68 in 1 : vector<16x128xbf16>, vector<16x128xbf16> -> vector<16x256xbf16>
    %c0_29 = arith.constant 0 : index
    %c0_30 = arith.constant 0 : index
    %77 = vector.load %arg3[%c0_29, %c0_30] : memref<256x256xbf16, #tpu.memory_space<vmem>>, vector<256x256xbf16>
    %cst_31 = arith.constant dense<0.000000e+00> : vector<16x256xf32>
    %78 = tpu.matmul %76, %77, %cst_31 {dimension_numbers = #tpu.dot_dimension_numbers<[1], [0], [0], [1], [0, 0, 1, 1], [], []>} : vector<16x256xbf16>, vector<256x256xbf16>, vector<16x256xf32> -> vector<16x256xf32>
    %79 = vector.extract_strided_slice %78 {offsets = [0, 0], sizes = [16, 128], strides = [1, 1]} : vector<16x256xf32> to vector<16x128xf32>
    %80 = vector.extract_strided_slice %78 {offsets = [0, 128], sizes = [16, 128], strides = [1, 1]} : vector<16x256xf32> to vector<16x128xf32>
    %81 = arith.addf %80, %6 : vector<16x128xf32>
    %82 = math.tanh %81 : vector<16x128xf32>
    %83 = arith.truncf %82 : vector<16x128xf32> to vector<16x128xbf16>
    %c5_i32 = arith.constant 5 : i32
    %84 = arith.index_cast %c5_i32 : i32 to index
    %c0_32 = arith.constant 0 : index
    %c0_33 = arith.constant 0 : index
    %85 = vector.load %arg2[%84, %c0_32, %c0_33] : memref<8x16x128xbf16, #tpu.memory_space<vmem>>, vector<1x16x128xbf16>
    %86 = vector.shape_cast %85 : vector<1x16x128xbf16> to vector<16x128xbf16>
    %87 = arith.extf %86 : vector<16x128xbf16> to vector<16x128xf32>
    %88 = arith.addf %87, %79 : vector<16x128xf32>
    %89 = math.tanh %88 : vector<16x128xf32>
    %90 = arith.truncf %89 : vector<16x128xf32> to vector<16x128xbf16>
    %91 = tpu.concatenate %90, %83 in 1 : vector<16x128xbf16>, vector<16x128xbf16> -> vector<16x256xbf16>
    %c0_34 = arith.constant 0 : index
    %c0_35 = arith.constant 0 : index
    %92 = vector.load %arg3[%c0_34, %c0_35] : memref<256x256xbf16, #tpu.memory_space<vmem>>, vector<256x256xbf16>
    %cst_36 = arith.constant dense<0.000000e+00> : vector<16x256xf32>
    %93 = tpu.matmul %91, %92, %cst_36 {dimension_numbers = #tpu.dot_dimension_numbers<[1], [0], [0], [1], [0, 0, 1, 1], [], []>} : vector<16x256xbf16>, vector<256x256xbf16>, vector<16x256xf32> -> vector<16x256xf32>
    %94 = vector.extract_strided_slice %93 {offsets = [0, 0], sizes = [16, 128], strides = [1, 1]} : vector<16x256xf32> to vector<16x128xf32>
    %95 = vector.extract_strided_slice %93 {offsets = [0, 128], sizes = [16, 128], strides = [1, 1]} : vector<16x256xf32> to vector<16x128xf32>
    %96 = arith.addf %95, %6 : vector<16x128xf32>
    %97 = math.tanh %96 : vector<16x128xf32>
    %98 = arith.truncf %97 : vector<16x128xf32> to vector<16x128xbf16>
    %c6_i32 = arith.constant 6 : i32
    %99 = arith.index_cast %c6_i32 : i32 to index
    %c0_37 = arith.constant 0 : index
    %c0_38 = arith.constant 0 : index
    %100 = vector.load %arg2[%99, %c0_37, %c0_38] : memref<8x16x128xbf16, #tpu.memory_space<vmem>>, vector<1x16x128xbf16>
    %101 = vector.shape_cast %100 : vector<1x16x128xbf16> to vector<16x128xbf16>
    %102 = arith.extf %101 : vector<16x128xbf16> to vector<16x128xf32>
    %103 = arith.addf %102, %94 : vector<16x128xf32>
    %104 = math.tanh %103 : vector<16x128xf32>
    %105 = arith.truncf %104 : vector<16x128xf32> to vector<16x128xbf16>
    %106 = tpu.concatenate %105, %98 in 1 : vector<16x128xbf16>, vector<16x128xbf16> -> vector<16x256xbf16>
    %c0_39 = arith.constant 0 : index
    %c0_40 = arith.constant 0 : index
    %107 = vector.load %arg3[%c0_39, %c0_40] : memref<256x256xbf16, #tpu.memory_space<vmem>>, vector<256x256xbf16>
    %cst_41 = arith.constant dense<0.000000e+00> : vector<16x256xf32>
    %108 = tpu.matmul %106, %107, %cst_41 {dimension_numbers = #tpu.dot_dimension_numbers<[1], [0], [0], [1], [0, 0, 1, 1], [], []>} : vector<16x256xbf16>, vector<256x256xbf16>, vector<16x256xf32> -> vector<16x256xf32>
    %109 = vector.extract_strided_slice %108 {offsets = [0, 0], sizes = [16, 128], strides = [1, 1]} : vector<16x256xf32> to vector<16x128xf32>
    %110 = vector.extract_strided_slice %108 {offsets = [0, 128], sizes = [16, 128], strides = [1, 1]} : vector<16x256xf32> to vector<16x128xf32>
    %111 = arith.addf %110, %6 : vector<16x128xf32>
    %112 = math.tanh %111 : vector<16x128xf32>
    %113 = arith.truncf %112 : vector<16x128xf32> to vector<16x128xbf16>
    %c7_i32 = arith.constant 7 : i32
    %114 = arith.index_cast %c7_i32 : i32 to index
    %c0_42 = arith.constant 0 : index
    %c0_43 = arith.constant 0 : index
    %115 = vector.load %arg2[%114, %c0_42, %c0_43] : memref<8x16x128xbf16, #tpu.memory_space<vmem>>, vector<1x16x128xbf16>
    %116 = vector.shape_cast %115 : vector<1x16x128xbf16> to vector<16x128xbf16>
    %117 = arith.extf %116 : vector<16x128xbf16> to vector<16x128xf32>
    %118 = arith.addf %117, %109 : vector<16x128xf32>
    %119 = math.tanh %118 : vector<16x128xf32>
    %120 = arith.truncf %119 : vector<16x128xf32> to vector<16x128xbf16>
    %121 = tpu.concatenate %120, %113 in 1 : vector<16x128xbf16>, vector<16x128xbf16> -> vector<16x256xbf16>
    %c0_44 = arith.constant 0 : index
    %c0_45 = arith.constant 0 : index
    %122 = vector.load %arg3[%c0_44, %c0_45] : memref<256x256xbf16, #tpu.memory_space<vmem>>, vector<256x256xbf16>
    %cst_46 = arith.constant dense<0.000000e+00> : vector<16x256xf32>
    %123 = tpu.matmul %121, %122, %cst_46 {dimension_numbers = #tpu.dot_dimension_numbers<[1], [0], [0], [1], [0, 0, 1, 1], [], []>} : vector<16x256xbf16>, vector<256x256xbf16>, vector<16x256xf32> -> vector<16x256xf32>
    %124 = vector.extract_strided_slice %123 {offsets = [0, 0], sizes = [16, 128], strides = [1, 1]} : vector<16x256xf32> to vector<16x128xf32>
    %125 = vector.extract_strided_slice %123 {offsets = [0, 128], sizes = [16, 128], strides = [1, 1]} : vector<16x256xf32> to vector<16x128xf32>
    %126 = arith.addf %125, %6 : vector<16x128xf32>
    %127 = math.tanh %126 : vector<16x128xf32>
    %128 = arith.truncf %127 : vector<16x128xf32> to vector<16x128xbf16>
    %c8_i32 = arith.constant 8 : i32
    %true = arith.constant true
    %129 = arith.xori %0, %true : i1
    %130 = arith.extui %129 : i1 to i32
    %c0_i32_47 = arith.constant 0 : i32
    %131 = arith.cmpi ne, %130, %c0_i32_47 : i32
    scf.if %131 {
      %c0_49 = arith.constant 0 : index
      %c0_50 = arith.constant 0 : index
      %134 = vector.load %arg8[%c0_49, %c0_50] : memref<16x128xf32, #tpu.memory_space<vmem>>, vector<16x128xf32>
      tpu.vector_store %arg8[%c0_49, %c0_50], %124 {strides = array<i32>} : memref<16x128xf32, #tpu.memory_space<vmem>>, vector<16x128xf32>,
      %c0_51 = arith.constant 0 : index
      %c0_52 = arith.constant 0 : index
      %135 = vector.load %arg9[%c0_51, %c0_52] : memref<16x128xbf16, #tpu.memory_space<vmem>>, vector<16x128xbf16>
      tpu.vector_store %arg9[%c0_51, %c0_52], %128 {strides = array<i32>} : memref<16x128xbf16, #tpu.memory_space<vmem>>, vector<16x128xbf16>,
    } else {
    }
    %132 = arith.extui %0 : i1 to i32
    %c0_i32_48 = arith.constant 0 : i32
    %133 = arith.cmpi ne, %132, %c0_i32_48 : i32
    scf.if %133 {
      %c0_49 = arith.constant 0 : index
      %c0_50 = arith.constant 0 : index
      %134 = vector.load %arg5[%c0_49, %c0_50] : memref<128x128xbf16, #tpu.memory_space<vmem>>, vector<128x128xbf16>
      %cst_51 = arith.constant dense<0.000000e+00> : vector<16x128xf32>
      %135 = tpu.matmul %128, %134, %cst_51 {dimension_numbers = #tpu.dot_dimension_numbers<[1], [0], [0], [1], [0, 0, 1, 1], [], []>} : vector<16x128xbf16>, vector<128x128xbf16>, vector<16x128xf32> -> vector<16x128xf32>
      %c0_52 = arith.constant 0 : index
      %c0_53 = arith.constant 0 : index
      %136 = vector.load %arg6[%c0_52, %c0_53] : memref<1x128xf32, #tpu.memory_space<vmem>>, vector<1x128xf32>
      %137 = vector.broadcast %136 : vector<1x128xf32> to vector<16x128xf32>
      %138 = arith.addf %135, %137 : vector<16x128xf32>
      %c0_54 = arith.constant 0 : index
      %c0_55 = arith.constant 0 : index
      %139 = vector.load %arg7[%c0_54, %c0_55] : memref<16x128xf32, #tpu.memory_space<vmem>>, vector<16x128xf32>
      tpu.vector_store %arg7[%c0_54, %c0_55], %138 {strides = array<i32>} : memref<16x128xf32, #tpu.memory_space<vmem>>, vector<16x128xf32>,
    } else {
    }
    return
  }
  func.func @transform_0(%arg0: i32, %arg1: i32) -> (i32, i32, i32) {
    %c0_i32 = arith.constant 0 : i32
    %c0_i32_0 = arith.constant 0 : i32
    return %arg1, %arg0, %c0_i32 : i32, i32, i32
  }
  func.func @transform_1(%arg0: i32, %arg1: i32) -> (i32, i32) {
    %c0_i32 = arith.constant 0 : i32
    %c0_i32_0 = arith.constant 0 : i32
    %c0_i32_1 = arith.constant 0 : i32
    return %c0_i32, %c0_i32_0 : i32, i32
  }
  func.func @transform_2(%arg0: i32, %arg1: i32) -> (i32, i32) {
    %c0_i32 = arith.constant 0 : i32
    %c0_i32_0 = arith.constant 0 : i32
    %c0_i32_1 = arith.constant 0 : i32
    return %c0_i32, %c0_i32_0 : i32, i32
  }
  func.func @transform_3(%arg0: i32, %arg1: i32) -> (i32, i32) {
    %c0_i32 = arith.constant 0 : i32
    %c0_i32_0 = arith.constant 0 : i32
    %c0_i32_1 = arith.constant 0 : i32
    return %c0_i32, %c0_i32_0 : i32, i32
  }
  func.func @transform_4(%arg0: i32, %arg1: i32) -> (i32, i32) {
    %c0_i32 = arith.constant 0 : i32
    %c0_i32_0 = arith.constant 0 : i32
    %c0_i32_1 = arith.constant 0 : i32
    return %c0_i32, %c0_i32_0 : i32, i32
  }
  func.func @transform_5(%arg0: i32, %arg1: i32) -> (i32, i32) {
    %c0_i32 = arith.constant 0 : i32
    %c0_i32_0 = arith.constant 0 : i32
    return %arg0, %c0_i32 : i32, i32
  }
}

</mosaic_0001>

<bundles_post_ra>
// kernel: tpu_custom_call.1
= control target key start
LH: loop header
LB: loop body
LE: loop exit
PB: predicated region body
PF: predicated region fallthrough
CT: control target
= control target key end

     0   :  { %10 = vsyncpa [#allocation5], 0  ;;  %s1644_s0 = inlined_call_operand.hbm [shape: bf16[8,16,128], index: 0, kind: input, shape index: {}]   ;;  %s1645_s1 = inlined_call_operand.hbm [shape: bf16[256,256], index: 1, kind: input, shape index: {}]   ;;  %s1646_s2 = inlined_call_operand.vmem [shape: f32[1,128], index: 2, kind: input, shape index: {}]   ;;  %s1647_s3 = inlined_call_operand.hbm [shape: bf16[128,128], index: 3, kind: input, shape index: {}]   ;;  %s1648_s4 = inlined_call_operand.vmem [shape: f32[1,128], index: 4, kind: input, shape index: {}]   ;;  %s1649_s5 = inlined_call_operand.hbm [shape: f32[16,128], index: 5, kind: output, shape index: {}]  }
   0x1   :  { %11 = vsyncpa [#allocation8], 0 }
   0x2   :  { %12 = vsyncpa [#allocation6], 0  ;;  %s1205_s18 = smov [#allocation7]   ;;  %s1111_s22 = scalar_lea.hbm %s1645_s1, 4096 }
   0x3   :  { %s30_s19 = sshll.u32 %s1205_s18, 4  ;;  %p1112_p0 = scmp.ne.s32.totalorder %s1645_s1, %s1111_s22  ;;  %s31_s19 = int_to_ptr.vmem [resolvable:$true] %s30_s19 }
   0x4   :  { %p1115_p1 = scmp.lt.u32.totalorder %s1111_s22, %s1645_s1 }
   0x6   :  { %p1117_p2 = pnand %p1115_p1, %p1112_p0 }
   0x8   :  { %1120 = shalt.err (!%p1117_p2)
}
   0x9   :  { %s1121_s27 = scalar_lea.vmem %s31_s19, 4096  ;;  %p1126_p4 = scmp.lt.s32.totalorder %s31_s19, %s31_s19 }
   0xa   :  { %p1122_p3 = scmp.ne.s32.totalorder %s31_s19, %s1121_s27  ;;  %p1127_p5 = scmp.lt.s32.totalorder %s1121_s27, %s1121_s27 }
   0xc   :  { %p1128_p6 = por %p1127_p5, %p1126_p4 }
   0xe   :  { %p1129_p7 = pnand %p1128_p6, %p1122_p3 }
  0x10   :  { %1132 = shalt.err (!%p1129_p7)
}
  0x11   :  { %s1206_s28 = smov 128   ;;  %s1207_s29 = smov 8  }
  0x12   :  { %36 = dma.hbm_to_vmem [thread:$0]  %s1645_s1, 4096, %s31_s19, [#allocation8], %s1206_s28, %s1206_s28, %s1207_s29  }
  0x13   :  { %s1208_s7 = smov [#allocation4]   ;;  %s1133_s11 = scalar_lea.hbm %s1644_s0, 1024 }
  0x14   :  { %s18_s8 = sshll.u32 %s1208_s7, 4  ;;  %p1134_p8 = scmp.ne.s32.totalorder %s1644_s0, %s1133_s11  ;;  %s19_s8 = int_to_ptr.vmem [resolvable:$true] %s18_s8 }
  0x15   :  { %p1137_p9 = scmp.lt.u32.totalorder %s1133_s11, %s1644_s0 }
  0x17   :  { %p1139_p10 = pnand %p1137_p9, %p1134_p8 }
  0x19   :  { %1142 = shalt.err (!%p1139_p10)
}
  0x1a   :  { %s1143_s16 = scalar_lea.vmem %s19_s8, 1024  ;;  %p1148_p12 = scmp.lt.s32.totalorder %s19_s8, %s19_s8 }
  0x1b   :  { %p1144_p11 = scmp.ne.s32.totalorder %s19_s8, %s1143_s16  ;;  %p1149_p13 = scmp.lt.s32.totalorder %s1143_s16, %s1143_s16 }
  0x1d   :  { %p1150_p0 = por %p1149_p13, %p1148_p12 }
  0x1f   :  { %p1151_p1 = pnand %p1150_p0, %p1144_p11 }
  0x21   :  { %1154 = shalt.err (!%p1151_p1)
}
  0x22   :  { %s1209_s1 = smov 64   ;;  %s1210_s17 = smov 4  }
  0x23   :  { %24 = dma.hbm_to_vmem [thread:$0]  %s1644_s0, 1024, %s19_s8, [#allocation5], %s1209_s1, %s1209_s1, %s1210_s17  }
  0x24   :  { %s1211_s20 = smov [#allocation9]   ;;  %s1155_s24 = scalar_lea.hbm %s1647_s3, 1024 }
  0x25   :  { %s44_s21 = sshll.u32 %s1211_s20, 4  ;;  %p1156_p2 = scmp.ne.s32.totalorder %s1647_s3, %s1155_s24  ;;  %s45_s21 = int_to_ptr.vmem [resolvable:$true] %s44_s21 }
  0x26   :  { %p1159_p3 = scmp.lt.u32.totalorder %s1155_s24, %s1647_s3 }
  0x28   :  { %p1161_p4 = pnand %p1159_p3, %p1156_p2 }
  0x2a   :  { %1164 = shalt.err (!%p1161_p4)
}
  0x2b   :  { %s1165_s6 = scalar_lea.vmem %s45_s21, 1024  ;;  %p1170_p6 = scmp.lt.s32.totalorder %s45_s21, %s45_s21 }
  0x2c   :  { %p1166_p5 = scmp.ne.s32.totalorder %s45_s21, %s1165_s6  ;;  %p1171_p7 = scmp.lt.s32.totalorder %s1165_s6, %s1165_s6 }
  0x2e   :  { %p1172_p8 = por %p1171_p7, %p1170_p6 }
  0x30   :  { %p1173_p9 = pnand %p1172_p8, %p1166_p5 }
  0x32   :  { %1176 = shalt.err (!%p1173_p9)
}
  0x33   :  { %50 = dma.hbm_to_vmem [thread:$0]  %s1647_s3, 1024, %s45_s21, [#allocation8], %s1209_s1, %s1209_s1, %s1210_s17  }
  0x34   :  { %1199 = dma.done.wait [#allocation5], 1024  }
  0x35   :  { %1200 = vsyncadd [#allocation5], 4294966272 }
  0x36   :  { %1201 = dma.done.wait [#allocation8], 5120  }
  0x37   :  { %1202 = vsyncadd [#allocation8], 4294962176  ;;  %v1212_v0 = vmov 0   ;;  %v1285_v1 = vld [vmem:[#allocation7 + $0x4] ss:$8 sps:$4 sm:$0xff]   ;;  %v928_v57 = vld [vmem:[#allocation4 + $0x10] sm:$0xff]  }
  0x38   :  { %313 = vmatprep.mubr.bf16.mxu0 %v1212_v0  ;;  %v1287_v2 = vld [vmem:[#allocation7] ss:$8 sps:$4 sm:$0xff]   ;;  %281 = vmatprep.subr.bf16.mxu0 %v1285_v1  ;;  %v1290_v3 = vld [vmem:[#allocation7 + $0x14] ss:$8 sps:$4 sm:$0xff]   ;;  %v1294_v4 = vld [vmem:[#allocation7 + $0x10] ss:$8 sps:$4 sm:$0xff]   ;;  %v929_v58 = vunpack.c.l.bf16 %v928_v57  ;;  %v930_v59 = vunpack.c.h.bf16 %v928_v57 }
  0x39   :  { %339 = vmatprep.subr.bf16.mxu1 %v1285_v1  ;;  %282 = vmatpush1.bf16.msra.mxu0 %v1287_v2  ;;  %v1298_v5 = vld [vmem:[#allocation7 + $0x24] ss:$8 sps:$4 sm:$0xff]   ;;  %v1302_v6 = vld [vmem:[#allocation7 + $0x20] ss:$8 sps:$4 sm:$0xff]   ;;  %v1306_v7 = vld [vmem:[#allocation7 + $0x34] ss:$8 sps:$4 sm:$0xff]  }
  0x3a   :  { %340 = vmatpush1.bf16.msra.mxu1 %v1287_v2  ;;  %283 = vmatprep.subr.bf16.mxu0 %v1290_v3  ;;  %v1310_v8 = vld [vmem:[#allocation7 + $0x30] ss:$8 sps:$4 sm:$0xff]   ;;  %v1314_v9 = vld [vmem:[#allocation7 + $0x44] ss:$8 sps:$4 sm:$0xff]   ;;  %v1318_v10 = vld [vmem:[#allocation7 + $0x40] ss:$8 sps:$4 sm:$0xff]  }
  0x3b   :  { %341 = vmatprep.subr.bf16.mxu1 %v1290_v3  ;;  %v1322_v11 = vld [vmem:[#allocation7 + $0x54] ss:$8 sps:$4 sm:$0xff]   ;;  %v1326_v12 = vld [vmem:[#allocation7 + $0x50] ss:$8 sps:$4 sm:$0xff]   ;;  %v1330_v13 = vld [vmem:[#allocation7 + $0x64] ss:$8 sps:$4 sm:$0xff]  }
  0x3c   :  { %v1333_v14 = vld [vmem:[#allocation7 + $0x60] ss:$8 sps:$4 sm:$0xff]   ;;  %v1335_v15 = vld [vmem:[#allocation7 + $0x74] ss:$8 sps:$4 sm:$0xff]   ;;  %v1342_v16 = vld [vmem:[#allocation7 + $0x70] ss:$8 sps:$4 sm:$0xff]  }
  0x3d   :  { %284 = vmatpush1.bf16.msra.mxu0 %v1294_v4  ;;  %v1346_v17 = vld [vmem:[#allocation7 + $0x84] ss:$8 sps:$4 sm:$0xff]   ;;  %v1350_v18 = vld [vmem:[#allocation7 + $0x80] ss:$8 sps:$4 sm:$0xff]   ;;  %v1354_v19 = vld [vmem:[#allocation7 + $0x94] ss:$8 sps:$4 sm:$0xff]  }
  0x3e   :  { %342 = vmatpush1.bf16.msra.mxu1 %v1294_v4  ;;  %285 = vmatprep.subr.bf16.mxu0 %v1298_v5  ;;  %v1358_v20 = vld [vmem:[#allocation7 + $0x90] ss:$8 sps:$4 sm:$0xff]   ;;  %v1362_v21 = vld [vmem:[#allocation7 + $0xa4] ss:$8 sps:$4 sm:$0xff]   ;;  %v1366_v22 = vld [vmem:[#allocation7 + $0xa0] ss:$8 sps:$4 sm:$0xff]  }
  0x3f   :  { %343 = vmatprep.subr.bf16.mxu1 %v1298_v5  ;;  %v1370_v23 = vld [vmem:[#allocation7 + $0xb4] ss:$8 sps:$4 sm:$0xff]   ;;  %v920_v24 = vld [vmem:[#allocation4] sm:$0xff]   ;;  %v1374_v25 = vld [vmem:[#allocation7 + $0xb0] ss:$8 sps:$4 sm:$0xff]   ;;  %vm1214_vm0 = vmmov 0  }
  0x40   :  { %v1378_v26 = vld [vmem:[#allocation7 + $0xc4] ss:$8 sps:$4 sm:$0xff]   ;;  %v921_v27 = vunpack.c.l.bf16 %v920_v24  ;;  %v922_v28 = vunpack.c.h.bf16 %v920_v24  ;;  %v1382_v29 = vld [vmem:[#allocation7 + $0xc0] ss:$8 sps:$4 sm:$0xff]   ;;  %v1386_v30 = vld [vmem:[#allocation7 + $0xd4] ss:$8 sps:$4 sm:$0xff]  }
  0x41   :  { %286 = vmatpush1.bf16.msra.mxu0 %v1302_v6  ;;  %v1390_v31 = vld [vmem:[#allocation7 + $0xd0] ss:$8 sps:$4 sm:$0xff]   ;;  %v1394_v32 = vld [vmem:[#allocation7 + $0xe4] ss:$8 sps:$4 sm:$0xff]   ;;  %v1398_v33 = vld [vmem:[#allocation7 + $0xe0] ss:$8 sps:$4 sm:$0xff]  }
  0x42   :  { %344 = vmatpush1.bf16.msra.mxu1 %v1302_v6  ;;  %287 = vmatprep.subr.bf16.mxu0 %v1306_v7  ;;  %1047 = vtanh.f32 %v921_v27  ;;  %v1402_v34 = vld [vmem:[#allocation7 + $0xf4] ss:$8 sps:$4 sm:$0xff]   ;;  %v1406_v37 = vld [vmem:[#allocation7 + $0xf0] ss:$8 sps:$4 sm:$0xff]   ;;  %v924_v39 = vld [vmem:[#allocation4 + $0x8] sm:$0xff]   ;;  %s1215_s10 = smov [#allocation10]  }
  0x43   :  { %345 = vmatprep.subr.bf16.mxu1 %v1306_v7  ;;  %1049 = vtanh.f32 %v922_v28  ;;  %v925_v40 = vunpack.c.l.bf16 %v924_v39  ;;  %v1450_v41 = vld [vmem:[%s1646_s2] ss:$0 sm:$0xff]  ;;  %v926_v42 = vunpack.c.h.bf16 %v924_v39  ;;  %s864_s11 = sshll.u32 %s1215_s10, 4  ;;  %s865_s11 = int_to_ptr.vmem [resolvable:$true] %s864_s11 }
  0x44   :  { %s1177_s12 = scalar_lea.vmem %s865_s11, 256  ;;  %p1182_p11 = scmp.lt.s32.totalorder %s865_s11, %s865_s11 }
  0x45   :  { %288 = vmatpush1.bf16.msra.mxu0 %v1310_v8  ;;  %p1178_p10 = scmp.ne.s32.totalorder %s865_s11, %s1177_s12  ;;  %p1183_p12 = scmp.lt.s32.totalorder %s1177_s12, %s1177_s12 }
  0x46   :  { %346 = vmatpush1.bf16.msra.mxu1 %v1310_v8  ;;  %289 = vmatprep.subr.bf16.mxu0 %v1314_v9 }
  0x47   :  { %347 = vmatprep.subr.bf16.mxu1 %v1314_v9  ;;  %p1184_p13 = por %p1183_p12, %p1182_p11 }
  0x49   :  { %290 = vmatpush1.bf16.msra.mxu0 %v1318_v10  ;;  %p1185_p0 = pnand %p1184_p13, %p1178_p10 }
  0x4a   :  { %348 = vmatpush1.bf16.msra.mxu1 %v1318_v10  ;;  %291 = vmatprep.subr.bf16.mxu0 %v1322_v11 }
  0x4b   :  { %349 = vmatprep.subr.bf16.mxu1 %v1322_v11 }
  0x4c   :  { %v1048_v35 = vpop.eup %1047 }
  0x4d   :  { %292 = vmatpush1.bf16.msra.mxu0 %v1326_v12  ;;  %v1050_v36 = vpop.eup %1049 }
  0x4e   :  { %350 = vmatpush1.bf16.msra.mxu1 %v1326_v12  ;;  %293 = vmatprep.subr.bf16.mxu0 %v1330_v13  ;;  %v88_v38 = vpack.c.bf16 %v1050_v36, %v1048_v35 }
  0x4f   :  { %351 = vmatprep.subr.bf16.mxu1 %v1330_v13 }
  0x51   :  { %294 = vmatpush1.bf16.msra.mxu0 %v1333_v14 }
  0x52   :  { %352 = vmatpush1.bf16.msra.mxu1 %v1333_v14  ;;  %295 = vmatprep.subr.bf16.mxu0 %v1335_v15 }
  0x53   :  { %353 = vmatprep.subr.bf16.mxu1 %v1335_v15 }
  0x55   :  { %296 = vmatpush1.bf16.msra.mxu0 %v1342_v16 }
  0x56   :  { %354 = vmatpush1.bf16.msra.mxu1 %v1342_v16  ;;  %297 = vmatprep.subr.bf16.mxu0 %v1346_v17 }
  0x57   :  { %355 = vmatprep.subr.bf16.mxu1 %v1346_v17 }
  0x59   :  { %298 = vmatpush1.bf16.msra.mxu0 %v1350_v18 }
  0x5a   :  { %356 = vmatpush1.bf16.msra.mxu1 %v1350_v18  ;;  %299 = vmatprep.subr.bf16.mxu0 %v1354_v19 }
  0x5b   :  { %357 = vmatprep.subr.bf16.mxu1 %v1354_v19 }
  0x5d   :  { %300 = vmatpush1.bf16.msra.mxu0 %v1358_v20 }
  0x5e   :  { %358 = vmatpush1.bf16.msra.mxu1 %v1358_v20  ;;  %301 = vmatprep.subr.bf16.mxu0 %v1362_v21 }
  0x5f   :  { %359 = vmatprep.subr.bf16.mxu1 %v1362_v21 }
  0x61   :  { %302 = vmatpush1.bf16.msra.mxu0 %v1366_v22 }
  0x62   :  { %360 = vmatpush1.bf16.msra.mxu1 %v1366_v22  ;;  %303 = vmatprep.subr.bf16.mxu0 %v1370_v23 }
  0x63   :  { %361 = vmatprep.subr.bf16.mxu1 %v1370_v23 }
  0x65   :  { %304 = vmatpush1.bf16.msra.mxu0 %v1374_v25 }
  0x66   :  { %362 = vmatpush1.bf16.msra.mxu1 %v1374_v25  ;;  %305 = vmatprep.subr.bf16.mxu0 %v1378_v26 }
  0x67   :  { %363 = vmatprep.subr.bf16.mxu1 %v1378_v26 }
  0x69   :  { %306 = vmatpush1.bf16.msra.mxu0 %v1382_v29 }
  0x6a   :  { %364 = vmatpush1.bf16.msra.mxu1 %v1382_v29  ;;  %307 = vmatprep.subr.bf16.mxu0 %v1386_v30 }
  0x6b   :  { %365 = vmatprep.subr.bf16.mxu1 %v1386_v30 }
  0x6d   :  { %308 = vmatpush1.bf16.msra.mxu0 %v1390_v31 }
  0x6e   :  { %366 = vmatpush1.bf16.msra.mxu1 %v1390_v31  ;;  %309 = vmatprep.subr.bf16.mxu0 %v1394_v32 }
  0x6f   :  { %367 = vmatprep.subr.bf16.mxu1 %v1394_v32 }
  0x71   :  { %310 = vmatpush1.bf16.msra.mxu0 %v1398_v33 }
  0x72   :  { %368 = vmatpush1.bf16.msra.mxu1 %v1398_v33  ;;  %311 = vmatprep.subr.bf16.mxu0 %v1402_v34 }
  0x73   :  { %369 = vmatprep.subr.bf16.mxu1 %v1402_v34 }
  0x75   :  { %312 = vmatpush1.bf16.msra.mxu0 %v1406_v37 }
  0x76   :  { %370 = vmatpush1.bf16.msra.mxu1 %v1406_v37  ;;  %397 = vmatprep.subr.bf16.mxu0 %v1285_v1 }
  0x77   :  { %455 = vmatprep.subr.bf16.mxu1 %v1285_v1 }
  0x78   :  { %314 = vmatmul.mubr.bf16.vlgmr.msra.gmra.mrb[0].mxu0 %v88_v38 }
  0x79   :  { %398 = vmatpush1.bf16.msra.mxu0 %v1287_v2 }
  0x7a   :  { %399 = vmatprep.subr.bf16.mxu0 %v1290_v3 }
  0x7d   :  { %400 = vmatpush1.bf16.msra.mxu0 %v1294_v4 }
  0x7e   :  { %401 = vmatprep.subr.bf16.mxu0 %v1298_v5 }
  0x81   :  { %402 = vmatpush1.bf16.msra.mxu0 %v1302_v6 }
  0x82   :  { %403 = vmatprep.subr.bf16.mxu0 %v1306_v7 }
  0x85   :  { %404 = vmatpush1.bf16.msra.mxu0 %v1310_v8 }
  0x86   :  { %405 = vmatprep.subr.bf16.mxu0 %v1314_v9 }
  0x89   :  { %406 = vmatpush1.bf16.msra.mxu0 %v1318_v10 }
  0x8a   :  { %407 = vmatprep.subr.bf16.mxu0 %v1322_v11 }
  0x8d   :  { %408 = vmatpush1.bf16.msra.mxu0 %v1326_v12 }
  0x8e   :  { %409 = vmatprep.subr.bf16.mxu0 %v1330_v13 }
  0x91   :  { %410 = vmatpush1.bf16.msra.mxu0 %v1333_v14 }
  0x92   :  { %411 = vmatprep.subr.bf16.mxu0 %v1335_v15 }
  0x95   :  { %412 = vmatpush1.bf16.msra.mxu0 %v1342_v16 }
  0x96   :  { %413 = vmatprep.subr.bf16.mxu0 %v1346_v17 }
  0x99   :  { %414 = vmatpush1.bf16.msra.mxu0 %v1350_v18 }
  0x9a   :  { %415 = vmatprep.subr.bf16.mxu0 %v1354_v19 }
  0x9d   :  { %416 = vmatpush1.bf16.msra.mxu0 %v1358_v20 }
  0x9e   :  { %417 = vmatprep.subr.bf16.mxu0 %v1362_v21 }
  0xa1   :  { %418 = vmatpush1.bf16.msra.mxu0 %v1366_v22 }
  0xa2   :  { %419 = vmatprep.subr.bf16.mxu0 %v1370_v23 }
  0xa5   :  { %420 = vmatpush1.bf16.msra.mxu0 %v1374_v25 }
  0xa6   :  { %421 = vmatprep.subr.bf16.mxu0 %v1378_v26 }
  0xa9   :  { %422 = vmatpush1.bf16.msra.mxu0 %v1382_v29 }
  0xaa   :  { %423 = vmatprep.subr.bf16.mxu0 %v1386_v30 }
  0xad   :  { %424 = vmatpush1.bf16.msra.mxu0 %v1390_v31 }
  0xae   :  { %425 = vmatprep.subr.bf16.mxu0 %v1394_v32 }
  0xb1   :  { %426 = vmatpush1.bf16.msra.mxu0 %v1398_v33 }
  0xb2   :  { %427 = vmatprep.subr.bf16.mxu0 %v1402_v34 }
  0xb5   :  { %428 = vmatpush1.bf16.msra.mxu0 %v1406_v37 }
  0xb6   :  { %513 = vmatprep.subr.bf16.mxu0 %v1285_v1 }
 0x14b   :  { %v315_v43 = vpop.f32.mrb[0].mxu0 }
 0x14c   :  { %v334_v44 = vadd.f32 %v925_v40, %v315_v43  ;;  %v317_v45 = vpop.f32.mrb[1].mxu0  ;;  %v932_v43 = vld [vmem:[#allocation4 + $0x18] sm:$0xff]  }
 0x14d   :  { %v324_v46 = vadd.f32 %v1450_v41, %v317_v45  ;;  %v319_v47 = vpop.f32.mrb[2].mxu0  ;;  %v934_v45 = vunpack.c.h.bf16 %v932_v43 }
 0x14e   :  { %1051 = vtanh.f32 %v334_v44  ;;  %v335_v48 = vadd.f32 %v926_v42, %v319_v47  ;;  %v321_v49 = vpop.f32.mrb[3].mxu0  ;;  %v933_v44 = vunpack.c.l.bf16 %v932_v43 }
 0x14f   :  { %1053 = vtanh.f32 %v324_v46  ;;  %v325_v50 = vadd.f32 %v1450_v41, %v321_v49 }
 0x150   :  { %1055 = vtanh.f32 %v335_v48 }
 0x151   :  { %1057 = vtanh.f32 %v325_v50 }
 0x158   :  { %v1052_v51 = vpop.eup %1051 }
 0x159   :  { %v1054_v52 = vpop.eup %1053 }
 0x15a   :  { %v1056_v53 = vpop.eup %1055 }
 0x15b   :  { %v1058_v54 = vpop.eup %1057  ;;  %v338_v55 = vpack.c.bf16 %v1056_v53, %v1052_v51 }
 0x15c   :  { %v328_v56 = vpack.c.bf16 %v1058_v54, %v1054_v52 }
 0x15e   :  { %371 = vmatprep.mubr.bf16.mxu1 %v328_v56 }
 0x15f   :  { %372 = vmatmul.mubr.bf16.vlgmr.msra.gmra.mrb[0].mxu1 %v338_v55 }
 0x160   :  { %456 = vmatpush1.bf16.msra.mxu1 %v1287_v2 }
 0x161   :  { %457 = vmatprep.subr.bf16.mxu1 %v1290_v3 }
 0x164   :  { %458 = vmatpush1.bf16.msra.mxu1 %v1294_v4 }
 0x165   :  { %459 = vmatprep.subr.bf16.mxu1 %v1298_v5 }
 0x168   :  { %460 = vmatpush1.bf16.msra.mxu1 %v1302_v6 }
 0x169   :  { %461 = vmatprep.subr.bf16.mxu1 %v1306_v7 }
 0x16c   :  { %462 = vmatpush1.bf16.msra.mxu1 %v1310_v8 }
 0x16d   :  { %463 = vmatprep.subr.bf16.mxu1 %v1314_v9 }
 0x170   :  { %464 = vmatpush1.bf16.msra.mxu1 %v1318_v10 }
 0x171   :  { %465 = vmatprep.subr.bf16.mxu1 %v1322_v11 }
 0x174   :  { %466 = vmatpush1.bf16.msra.mxu1 %v1326_v12 }
 0x175   :  { %467 = vmatprep.subr.bf16.mxu1 %v1330_v13 }
 0x178   :  { %468 = vmatpush1.bf16.msra.mxu1 %v1333_v14 }
 0x179   :  { %469 = vmatprep.subr.bf16.mxu1 %v1335_v15 }
 0x17c   :  { %470 = vmatpush1.bf16.msra.mxu1 %v1342_v16 }
 0x17d   :  { %471 = vmatprep.subr.bf16.mxu1 %v1346_v17 }
 0x180   :  { %472 = vmatpush1.bf16.msra.mxu1 %v1350_v18 }
 0x181   :  { %473 = vmatprep.subr.bf16.mxu1 %v1354_v19 }
 0x184   :  { %474 = vmatpush1.bf16.msra.mxu1 %v1358_v20 }
 0x185   :  { %475 = vmatprep.subr.bf16.mxu1 %v1362_v21 }
 0x188   :  { %476 = vmatpush1.bf16.msra.mxu1 %v1366_v22 }
 0x189   :  { %477 = vmatprep.subr.bf16.mxu1 %v1370_v23 }
 0x18c   :  { %478 = vmatpush1.bf16.msra.mxu1 %v1374_v25 }
 0x18d   :  { %479 = vmatprep.subr.bf16.mxu1 %v1378_v26 }
 0x190   :  { %480 = vmatpush1.bf16.msra.mxu1 %v1382_v29 }
 0x191   :  { %481 = vmatprep.subr.bf16.mxu1 %v1386_v30 }
 0x194   :  { %482 = vmatpush1.bf16.msra.mxu1 %v1390_v31 }
 0x195   :  { %483 = vmatprep.subr.bf16.mxu1 %v1394_v32 }
 0x198   :  { %484 = vmatpush1.bf16.msra.mxu1 %v1398_v33 }
 0x199   :  { %485 = vmatprep.subr.bf16.mxu1 %v1402_v34 }
 0x19c   :  { %486 = vmatpush1.bf16.msra.mxu1 %v1406_v37 }
 0x19d   :  { %571 = vmatprep.subr.bf16.mxu1 %v1285_v1 }
 0x232   :  { %v373_v60 = vpop.f32.mrb[0].mxu1 }
 0x233   :  { %v392_v61 = vadd.f32 %v929_v58, %v373_v60  ;;  %v375_v62 = vpop.f32.mrb[1].mxu1  ;;  %v936_v60 = vld [vmem:[#allocation4 + $0x20] sm:$0xff]  }
 0x234   :  { %v382_v63 = vadd.f32 %v1450_v41, %v375_v62  ;;  %v377_v0 = vpop.f32.mrb[2].mxu1  ;;  %v938_v62 = vunpack.c.h.bf16 %v936_v60 }
 0x235   :  { %1059 = vtanh.f32 %v392_v61  ;;  %v393_v24 = vadd.f32 %v930_v59, %v377_v0  ;;  %v379_v27 = vpop.f32.mrb[3].mxu1  ;;  %v937_v61 = vunpack.c.l.bf16 %v936_v60 }
 0x236   :  { %1061 = vtanh.f32 %v382_v63  ;;  %v383_v28 = vadd.f32 %v1450_v41, %v379_v27 }
 0x237   :  { %1063 = vtanh.f32 %v393_v24 }
 0x238   :  { %1065 = vtanh.f32 %v383_v28 }
 0x23f   :  { %v1060_v35 = vpop.eup %1059 }
 0x240   :  { %v1062_v36 = vpop.eup %1061 }
 0x241   :  { %v1064_v38 = vpop.eup %1063 }
 0x242   :  { %v1066_v39 = vpop.eup %1065  ;;  %v396_v40 = vpack.c.bf16 %v1064_v38, %v1060_v35 }
 0x243   :  { %v386_v42 = vpack.c.bf16 %v1066_v39, %v1062_v36 }
 0x245   :  { %429 = vmatprep.mubr.bf16.mxu0 %v386_v42 }
 0x246   :  { %430 = vmatmul.mubr.bf16.vlgmr.msra.gmra.mrb[4].mxu0 %v396_v40 }
 0x247   :  { %514 = vmatpush1.bf16.msra.mxu0 %v1287_v2 }
 0x248   :  { %515 = vmatprep.subr.bf16.mxu0 %v1290_v3 }
 0x24b   :  { %516 = vmatpush1.bf16.msra.mxu0 %v1294_v4 }
 0x24c   :  { %517 = vmatprep.subr.bf16.mxu0 %v1298_v5 }
 0x24f   :  { %518 = vmatpush1.bf16.msra.mxu0 %v1302_v6 }
 0x250   :  { %519 = vmatprep.subr.bf16.mxu0 %v1306_v7 }
 0x253   :  { %520 = vmatpush1.bf16.msra.mxu0 %v1310_v8 }
 0x254   :  { %521 = vmatprep.subr.bf16.mxu0 %v1314_v9 }
 0x257   :  { %522 = vmatpush1.bf16.msra.mxu0 %v1318_v10 }
 0x258   :  { %523 = vmatprep.subr.bf16.mxu0 %v1322_v11 }
 0x25b   :  { %524 = vmatpush1.bf16.msra.mxu0 %v1326_v12 }
 0x25c   :  { %525 = vmatprep.subr.bf16.mxu0 %v1330_v13 }
 0x25f   :  { %526 = vmatpush1.bf16.msra.mxu0 %v1333_v14 }
 0x260   :  { %527 = vmatprep.subr.bf16.mxu0 %v1335_v15 }
 0x263   :  { %528 = vmatpush1.bf16.msra.mxu0 %v1342_v16 }
 0x264   :  { %529 = vmatprep.subr.bf16.mxu0 %v1346_v17 }
 0x267   :  { %530 = vmatpush1.bf16.msra.mxu0 %v1350_v18 }
 0x268   :  { %531 = vmatprep.subr.bf16.mxu0 %v1354_v19 }
 0x26b   :  { %532 = vmatpush1.bf16.msra.mxu0 %v1358_v20 }
 0x26c   :  { %533 = vmatprep.subr.bf16.mxu0 %v1362_v21 }
 0x26f   :  { %534 = vmatpush1.bf16.msra.mxu0 %v1366_v22 }
 0x270   :  { %535 = vmatprep.subr.bf16.mxu0 %v1370_v23 }
 0x273   :  { %536 = vmatpush1.bf16.msra.mxu0 %v1374_v25 }
 0x274   :  { %537 = vmatprep.subr.bf16.mxu0 %v1378_v26 }
 0x277   :  { %538 = vmatpush1.bf16.msra.mxu0 %v1382_v29 }
 0x278   :  { %539 = vmatprep.subr.bf16.mxu0 %v1386_v30 }
 0x27b   :  { %540 = vmatpush1.bf16.msra.mxu0 %v1390_v31 }
 0x27c   :  { %541 = vmatprep.subr.bf16.mxu0 %v1394_v32 }
 0x27f   :  { %542 = vmatpush1.bf16.msra.mxu0 %v1398_v33 }
 0x280   :  { %543 = vmatprep.subr.bf16.mxu0 %v1402_v34 }
 0x283   :  { %544 = vmatpush1.bf16.msra.mxu0 %v1406_v37 }
 0x284   :  { %629 = vmatprep.subr.bf16.mxu0 %v1285_v1 }
 0x319   :  { %v431_v46 = vpop.f32.mrb[4].mxu0 }
 0x31a   :  { %v450_v47 = vadd.f32 %v933_v44, %v431_v46  ;;  %v433_v48 = vpop.f32.mrb[5].mxu0 }
 0x31b   :  { %v440_v49 = vadd.f32 %v1450_v41, %v433_v48  ;;  %v435_v50 = vpop.f32.mrb[6].mxu0 }
 0x31c   :  { %1067 = vtanh.f32 %v450_v47  ;;  %v451_v51 = vadd.f32 %v934_v45, %v435_v50  ;;  %v437_v52 = vpop.f32.mrb[7].mxu0  ;;  %v940_v45 = vld [vmem:[#allocation4 + $0x28] sm:$0xff]  }
 0x31d   :  { %1069 = vtanh.f32 %v440_v49  ;;  %v441_v53 = vadd.f32 %v1450_v41, %v437_v52  ;;  %v941_v46 = vunpack.c.l.bf16 %v940_v45  ;;  %v942_v47 = vunpack.c.h.bf16 %v940_v45 }
 0x31e   :  { %1071 = vtanh.f32 %v451_v51 }
 0x31f   :  { %1073 = vtanh.f32 %v441_v53 }
 0x326   :  { %v1068_v54 = vpop.eup %1067 }
 0x327   :  { %v1070_v55 = vpop.eup %1069 }
 0x328   :  { %v1072_v56 = vpop.eup %1071 }
 0x329   :  { %v1074_v57 = vpop.eup %1073  ;;  %v454_v58 = vpack.c.bf16 %v1072_v56, %v1068_v54 }
 0x32a   :  { %v444_v59 = vpack.c.bf16 %v1074_v57, %v1070_v55 }
 0x32c   :  { %487 = vmatprep.mubr.bf16.mxu1 %v444_v59 }
 0x32d   :  { %488 = vmatmul.mubr.bf16.vlgmr.msra.gmra.mrb[4].mxu1 %v454_v58 }
 0x32e   :  { %572 = vmatpush1.bf16.msra.mxu1 %v1287_v2 }
 0x32f   :  { %573 = vmatprep.subr.bf16.mxu1 %v1290_v3 }
 0x332   :  { %574 = vmatpush1.bf16.msra.mxu1 %v1294_v4 }
 0x333   :  { %575 = vmatprep.subr.bf16.mxu1 %v1298_v5 }
 0x336   :  { %576 = vmatpush1.bf16.msra.mxu1 %v1302_v6 }
 0x337   :  { %577 = vmatprep.subr.bf16.mxu1 %v1306_v7 }
 0x33a   :  { %578 = vmatpush1.bf16.msra.mxu1 %v1310_v8 }
 0x33b   :  { %579 = vmatprep.subr.bf16.mxu1 %v1314_v9 }
 0x33e   :  { %580 = vmatpush1.bf16.msra.mxu1 %v1318_v10 }
 0x33f   :  { %581 = vmatprep.subr.bf16.mxu1 %v1322_v11 }
 0x342   :  { %582 = vmatpush1.bf16.msra.mxu1 %v1326_v12 }
 0x343   :  { %583 = vmatprep.subr.bf16.mxu1 %v1330_v13 }
 0x346   :  { %584 = vmatpush1.bf16.msra.mxu1 %v1333_v14 }
 0x347   :  { %585 = vmatprep.subr.bf16.mxu1 %v1335_v15 }
 0x34a   :  { %586 = vmatpush1.bf16.msra.mxu1 %v1342_v16 }
 0x34b   :  { %587 = vmatprep.subr.bf16.mxu1 %v1346_v17 }
 0x34e   :  { %588 = vmatpush1.bf16.msra.mxu1 %v1350_v18 }
 0x34f   :  { %589 = vmatprep.subr.bf16.mxu1 %v1354_v19 }
 0x352   :  { %590 = vmatpush1.bf16.msra.mxu1 %v1358_v20 }
 0x353   :  { %591 = vmatprep.subr.bf16.mxu1 %v1362_v21 }
 0x356   :  { %592 = vmatpush1.bf16.msra.mxu1 %v1366_v22 }
 0x357   :  { %593 = vmatprep.subr.bf16.mxu1 %v1370_v23 }
 0x35a   :  { %594 = vmatpush1.bf16.msra.mxu1 %v1374_v25 }
 0x35b   :  { %595 = vmatprep.subr.bf16.mxu1 %v1378_v26 }
 0x35e   :  { %596 = vmatpush1.bf16.msra.mxu1 %v1382_v29 }
 0x35f   :  { %597 = vmatprep.subr.bf16.mxu1 %v1386_v30 }
 0x362   :  { %598 = vmatpush1.bf16.msra.mxu1 %v1390_v31 }
 0x363   :  { %599 = vmatprep.subr.bf16.mxu1 %v1394_v32 }
 0x366   :  { %600 = vmatpush1.bf16.msra.mxu1 %v1398_v33 }
 0x367   :  { %601 = vmatprep.subr.bf16.mxu1 %v1402_v34 }
 0x36a   :  { %602 = vmatpush1.bf16.msra.mxu1 %v1406_v37 }
 0x36b   :  { %687 = vmatprep.subr.bf16.mxu1 %v1285_v1 }
 0x400   :  { %v489_v63 = vpop.f32.mrb[4].mxu1 }
 0x401   :  { %v508_v0 = vadd.f32 %v937_v61, %v489_v63  ;;  %v491_v24 = vpop.f32.mrb[5].mxu1 }
 0x402   :  { %v498_v27 = vadd.f32 %v1450_v41, %v491_v24  ;;  %v493_v28 = vpop.f32.mrb[6].mxu1 }
 0x403   :  { %1075 = vtanh.f32 %v508_v0  ;;  %v509_v35 = vadd.f32 %v938_v62, %v493_v28  ;;  %v495_v36 = vpop.f32.mrb[7].mxu1 }
 0x404   :  { %1077 = vtanh.f32 %v498_v27  ;;  %v499_v38 = vadd.f32 %v1450_v41, %v495_v36  ;;  %v1042_v36 = vld [vmem:[#allocation9 + $0x18] sm:$0xff]  }
 0x405   :  { %1079 = vtanh.f32 %v509_v35 }
 0x406   :  { %1081 = vtanh.f32 %v499_v38  ;;  %v1043_v38 = vld [vmem:[#allocation9 + $0x20] sm:$0xff]  }
 0x40d   :  { %v1076_v39 = vpop.eup %1075 }
 0x40e   :  { %v1078_v40 = vpop.eup %1077 }
 0x40f   :  { %v1080_v1 = vpop.eup %1079 }
 0x410   :  { %v1082_v42 = vpop.eup %1081  ;;  %v512_v43 = vpack.c.bf16 %v1080_v1, %v1076_v39  ;;  %v1044_v39 = vld [vmem:[#allocation9 + $0x28] sm:$0xff]   ;;  %v1046_v1 = vld [vmem:[#allocation9 + $0x38] sm:$0xff]  }
 0x411   :  { %v502_v44 = vpack.c.bf16 %v1082_v42, %v1078_v40  ;;  %v1045_v40 = vld [vmem:[#allocation9 + $0x30] sm:$0xff]  }
 0x413   :  { %545 = vmatprep.mubr.bf16.mxu0 %v502_v44 }
 0x414   :  { %546 = vmatmul.mubr.bf16.vlgmr.msra.gmra.mrb[8].mxu0 %v512_v43 }
 0x415   :  { %630 = vmatpush1.bf16.msra.mxu0 %v1287_v2 }
 0x416   :  { %631 = vmatprep.subr.bf16.mxu0 %v1290_v3 }
 0x419   :  { %632 = vmatpush1.bf16.msra.mxu0 %v1294_v4 }
 0x41a   :  { %633 = vmatprep.subr.bf16.mxu0 %v1298_v5 }
 0x41d   :  { %634 = vmatpush1.bf16.msra.mxu0 %v1302_v6 }
 0x41e   :  { %635 = vmatprep.subr.bf16.mxu0 %v1306_v7 }
 0x421   :  { %636 = vmatpush1.bf16.msra.mxu0 %v1310_v8 }
 0x422   :  { %637 = vmatprep.subr.bf16.mxu0 %v1314_v9 }
 0x425   :  { %638 = vmatpush1.bf16.msra.mxu0 %v1318_v10 }
 0x426   :  { %639 = vmatprep.subr.bf16.mxu0 %v1322_v11 }
 0x429   :  { %640 = vmatpush1.bf16.msra.mxu0 %v1326_v12 }
 0x42a   :  { %641 = vmatprep.subr.bf16.mxu0 %v1330_v13 }
 0x42d   :  { %642 = vmatpush1.bf16.msra.mxu0 %v1333_v14 }
 0x42e   :  { %643 = vmatprep.subr.bf16.mxu0 %v1335_v15 }
 0x431   :  { %644 = vmatpush1.bf16.msra.mxu0 %v1342_v16 }
 0x432   :  { %645 = vmatprep.subr.bf16.mxu0 %v1346_v17 }
 0x435   :  { %646 = vmatpush1.bf16.msra.mxu0 %v1350_v18 }
 0x436   :  { %647 = vmatprep.subr.bf16.mxu0 %v1354_v19 }
 0x439   :  { %648 = vmatpush1.bf16.msra.mxu0 %v1358_v20 }
 0x43a   :  { %649 = vmatprep.subr.bf16.mxu0 %v1362_v21 }
 0x43d   :  { %650 = vmatpush1.bf16.msra.mxu0 %v1366_v22 }
 0x43e   :  { %651 = vmatprep.subr.bf16.mxu0 %v1370_v23 }
 0x441   :  { %652 = vmatpush1.bf16.msra.mxu0 %v1374_v25 }
 0x442   :  { %653 = vmatprep.subr.bf16.mxu0 %v1378_v26 }
 0x445   :  { %654 = vmatpush1.bf16.msra.mxu0 %v1382_v29 }
 0x446   :  { %655 = vmatprep.subr.bf16.mxu0 %v1386_v30 }
 0x449   :  { %656 = vmatpush1.bf16.msra.mxu0 %v1390_v31 }
 0x44a   :  { %657 = vmatprep.subr.bf16.mxu0 %v1394_v32 }
 0x44d   :  { %658 = vmatpush1.bf16.msra.mxu0 %v1398_v33 }
 0x44e   :  { %659 = vmatprep.subr.bf16.mxu0 %v1402_v34 }
 0x451   :  { %660 = vmatpush1.bf16.msra.mxu0 %v1406_v37 }
 0x4e7   :  { %v547_v48 = vpop.f32.mrb[8].mxu0 }
 0x4e8   :  { %v566_v49 = vadd.f32 %v941_v46, %v547_v48  ;;  %v549_v50 = vpop.f32.mrb[9].mxu0 }
 0x4e9   :  { %v556_v51 = vadd.f32 %v1450_v41, %v549_v50  ;;  %v551_v52 = vpop.f32.mrb[10].mxu0 }
 0x4ea   :  { %1083 = vtanh.f32 %v566_v49  ;;  %v567_v53 = vadd.f32 %v942_v47, %v551_v52  ;;  %v553_v54 = vpop.f32.mrb[11].mxu0 }
 0x4eb   :  { %1085 = vtanh.f32 %v556_v51  ;;  %v557_v55 = vadd.f32 %v1450_v41, %v553_v54  ;;  %v910_v51 = vld [vmem:[%s1648_s4] ss:$0 sm:$0xff] }
 0x4ec   :  { %1087 = vtanh.f32 %v567_v53 }
 0x4ed   :  { %1089 = vtanh.f32 %v557_v55 }
 0x4f4   :  { %v1084_v56 = vpop.eup %1083 }
 0x4f5   :  { %v1086_v57 = vpop.eup %1085 }
 0x4f6   :  { %v1088_v58 = vpop.eup %1087 }
 0x4f7   :  { %v1090_v59 = vpop.eup %1089  ;;  %v570_v60 = vpack.c.bf16 %v1088_v58, %v1084_v56 }
 0x4f8   :  { %v560_v61 = vpack.c.bf16 %v1090_v59, %v1086_v57 }
 0x4fa   :  { %603 = vmatprep.mubr.bf16.mxu1 %v560_v61 }
 0x4fb   :  { %604 = vmatmul.mubr.bf16.vlgmr.msra.gmra.mrb[8].mxu1 %v570_v60 }
 0x4fc   :  { %688 = vmatpush1.bf16.msra.mxu1 %v1287_v2  ;;  %v944_v2 = vld [vmem:[#allocation4 + $0x30] sm:$0xff]  }
 0x4fd   :  { %689 = vmatprep.subr.bf16.mxu1 %v1290_v3  ;;  %v945_v3 = vunpack.c.l.bf16 %v944_v2 }
 0x500   :  { %690 = vmatpush1.bf16.msra.mxu1 %v1294_v4  ;;  %v946_v4 = vunpack.c.h.bf16 %v944_v2 }
 0x501   :  { %691 = vmatprep.subr.bf16.mxu1 %v1298_v5 }
 0x504   :  { %692 = vmatpush1.bf16.msra.mxu1 %v1302_v6 }
 0x505   :  { %693 = vmatprep.subr.bf16.mxu1 %v1306_v7 }
 0x508   :  { %694 = vmatpush1.bf16.msra.mxu1 %v1310_v8 }
 0x509   :  { %695 = vmatprep.subr.bf16.mxu1 %v1314_v9 }
 0x50c   :  { %696 = vmatpush1.bf16.msra.mxu1 %v1318_v10 }
 0x50d   :  { %697 = vmatprep.subr.bf16.mxu1 %v1322_v11 }
 0x510   :  { %698 = vmatpush1.bf16.msra.mxu1 %v1326_v12 }
 0x511   :  { %699 = vmatprep.subr.bf16.mxu1 %v1330_v13 }
 0x514   :  { %700 = vmatpush1.bf16.msra.mxu1 %v1333_v14 }
 0x515   :  { %701 = vmatprep.subr.bf16.mxu1 %v1335_v15 }
 0x518   :  { %702 = vmatpush1.bf16.msra.mxu1 %v1342_v16 }
 0x519   :  { %703 = vmatprep.subr.bf16.mxu1 %v1346_v17 }
 0x51c   :  { %704 = vmatpush1.bf16.msra.mxu1 %v1350_v18 }
 0x51d   :  { %705 = vmatprep.subr.bf16.mxu1 %v1354_v19  ;;  %v1039_v19 = vld [vmem:[#allocation9] sm:$0xff]  }
 0x520   :  { %706 = vmatpush1.bf16.msra.mxu1 %v1358_v20  ;;  %v1213_v20 = vmov 0.0  }
 0x521   :  { %707 = vmatprep.subr.bf16.mxu1 %v1362_v21  ;;  %960 = vmatprep.subr.bf16.mxu0 %v1213_v20  ;;  %v1040_v21 = vld [vmem:[#allocation9 + $0x8] sm:$0xff]  }
 0x524   :  { %708 = vmatpush1.bf16.msra.mxu1 %v1366_v22  ;;  %v1041_v22 = vld [vmem:[#allocation9 + $0x10] sm:$0xff]  }
 0x525   :  { %709 = vmatprep.subr.bf16.mxu1 %v1370_v23  ;;  %v948_v23 = vld [vmem:[#allocation4 + $0x38] sm:$0xff]  }
 0x528   :  { %710 = vmatpush1.bf16.msra.mxu1 %v1374_v25  ;;  %v949_v25 = vunpack.c.l.bf16 %v948_v23 }
 0x529   :  { %711 = vmatprep.subr.bf16.mxu1 %v1378_v26  ;;  %v950_v26 = vunpack.c.h.bf16 %v948_v23 }
 0x52c   :  { %712 = vmatpush1.bf16.msra.mxu1 %v1382_v29 }
 0x52d   :  { %713 = vmatprep.subr.bf16.mxu1 %v1386_v30 }
 0x530   :  { %714 = vmatpush1.bf16.msra.mxu1 %v1390_v31 }
 0x531   :  { %715 = vmatprep.subr.bf16.mxu1 %v1394_v32 }
 0x534   :  { %716 = vmatpush1.bf16.msra.mxu1 %v1398_v33 }
 0x535   :  { %717 = vmatprep.subr.bf16.mxu1 %v1402_v34 }
 0x538   :  { %718 = vmatpush1.bf16.msra.mxu1 %v1406_v37 }
 0x5ce   :  { %v605_v5 = vpop.f32.mrb[8].mxu1 }
 0x5cf   :  { %v624_v6 = vadd.f32 %v945_v3, %v605_v5  ;;  %v607_v7 = vpop.f32.mrb[9].mxu1 }
 0x5d0   :  { %v614_v8 = vadd.f32 %v1450_v41, %v607_v7  ;;  %v609_v9 = vpop.f32.mrb[10].mxu1 }
 0x5d1   :  { %1091 = vtanh.f32 %v624_v6  ;;  %v625_v10 = vadd.f32 %v946_v4, %v609_v9  ;;  %v611_v11 = vpop.f32.mrb[11].mxu1 }
 0x5d2   :  { %1093 = vtanh.f32 %v614_v8  ;;  %v615_v12 = vadd.f32 %v1450_v41, %v611_v11 }
 0x5d3   :  { %1095 = vtanh.f32 %v625_v10 }
 0x5d4   :  { %1097 = vtanh.f32 %v615_v12 }
 0x5db   :  { %v1092_v13 = vpop.eup %1091 }
 0x5dc   :  { %v1094_v14 = vpop.eup %1093 }
 0x5dd   :  { %v1096_v15 = vpop.eup %1095 }
 0x5de   :  { %v1098_v16 = vpop.eup %1097  ;;  %v628_v17 = vpack.c.bf16 %v1096_v15, %v1092_v13 }
 0x5df   :  { %v618_v18 = vpack.c.bf16 %v1098_v16, %v1094_v14 }
 0x5e1   :  { %661 = vmatprep.mubr.bf16.mxu0 %v618_v18 }
 0x5e2   :  { %662 = vmatmul.mubr.bf16.vlgmr.msra.gmra.mrb[12].mxu0 %v628_v17 }
 0x5e3   :  { %961 = vmatpush3.bf16.msra.mxu0 %v1039_v19  ;;  %976 = vmatprep.mubr.msk.bf16.mxu0 %vm1214_vm0, %v1213_v20 }
 0x5e4   :  { %962 = vmatprep.subr.bf16.mxu0 %v1213_v20 }
 0x5e7   :  { %963 = vmatpush3.bf16.msra.mxu0 %v1040_v21 }
 0x5e8   :  { %964 = vmatprep.subr.bf16.mxu0 %v1213_v20 }
 0x5eb   :  { %965 = vmatpush3.bf16.msra.mxu0 %v1041_v22 }
 0x5ec   :  { %966 = vmatprep.subr.bf16.mxu0 %v1213_v20 }
 0x5ef   :  { %967 = vmatpush3.bf16.msra.mxu0 %v1042_v36 }
 0x5f0   :  { %968 = vmatprep.subr.bf16.mxu0 %v1213_v20 }
 0x5f3   :  { %969 = vmatpush3.bf16.msra.mxu0 %v1043_v38 }
 0x5f4   :  { %970 = vmatprep.subr.bf16.mxu0 %v1213_v20 }
 0x5f7   :  { %971 = vmatpush3.bf16.msra.mxu0 %v1044_v39 }
 0x5f8   :  { %972 = vmatprep.subr.bf16.mxu0 %v1213_v20 }
 0x5fb   :  { %973 = vmatpush3.bf16.msra.mxu0 %v1045_v40 }
 0x5fc   :  { %974 = vmatprep.subr.bf16.mxu0 %v1213_v20 }
 0x5ff   :  { %975 = vmatpush3.bf16.msra.mxu0 %v1046_v1 }
 0x6b5   :  { %v663_v29 = vpop.f32.mrb[12].mxu0 }
 0x6b6   :  { %v682_v30 = vadd.f32 %v949_v25, %v663_v29  ;;  %v665_v31 = vpop.f32.mrb[13].mxu0 }
 0x6b7   :  { %v672_v32 = vadd.f32 %v1450_v41, %v665_v31  ;;  %v667_v33 = vpop.f32.mrb[14].mxu0 }
 0x6b8   :  { %1099 = vtanh.f32 %v682_v30  ;;  %v683_v34 = vadd.f32 %v950_v26, %v667_v33  ;;  %v669_v37 = vpop.f32.mrb[15].mxu0 }
 0x6b9   :  { %1101 = vtanh.f32 %v672_v32  ;;  %v673_v62 = vadd.f32 %v1450_v41, %v669_v37 }
 0x6ba   :  { %1103 = vtanh.f32 %v683_v34 }
 0x6bb   :  { %1105 = vtanh.f32 %v673_v62 }
 0x6c2   :  { %v1100_v63 = vpop.eup %1099 }
 0x6c3   :  { %v1102_v0 = vpop.eup %1101 }
 0x6c4   :  { %v1104_v24 = vpop.eup %1103 }
 0x6c5   :  { %v1106_v27 = vpop.eup %1105  ;;  %v686_v28 = vpack.c.bf16 %v1104_v24, %v1100_v63 }
 0x6c6   :  { %v676_v35 = vpack.c.bf16 %v1106_v27, %v1102_v0 }
 0x6c8   :  { %719 = vmatprep.mubr.bf16.mxu1 %v676_v35 }
 0x6c9   :  { %720 = vmatmul.mubr.bf16.vlgmr.msra.gmra.mrb[12].mxu1 %v686_v28 }
 0x79c   :  { %v721_v42 = vpop.f32.mrb[12].mxu1 }
 0x79d   :  { %v723_v43 = vpop.f32.mrb[13].mxu1 }
 0x79e   :  { %v730_v44 = vadd.f32 %v1450_v41, %v723_v43  ;;  %v725_v45 = vpop.f32.mrb[14].mxu1 }
 0x79f   :  { %v727_v46 = vpop.f32.mrb[15].mxu1 }
 0x7a0   :  { %v731_v47 = vadd.f32 %v1450_v41, %v727_v46  ;;  %1107 = vtanh.f32 %v730_v44 }
 0x7a2   :  { %1109 = vtanh.f32 %v731_v47 }
 0x7aa   :  { %v1108_v48 = vpop.eup %1107 }
 0x7ac   :  { %v1110_v49 = vpop.eup %1109 }
 0x7ad   :  { %v734_v50 = vpack.c.bf16 %v1110_v49, %v1108_v48 }
 0x7af   :  { %977 = vmatmul.mubr.bf16.vlgmr.msra.gmra.mrb[16].mxu0 %v734_v50 }
 0x882   :  { %v850_v52 = vpop.f32.mrb[16].mxu0 }
 0x883   :  { %v851_v53 = vadd.f32 %v910_v51, %v850_v52  ;;  %v978_v54 = vpop.f32.mrb[17].mxu0 }
 0x884   :  { %v853_v55 = vpop.f32.mrb[18].mxu0 }
 0x885   :  { %857 = vst [vmem:[#allocation10] sm:$0xff] %v851_v53  ;;  %v854_v56 = vadd.f32 %v910_v51, %v853_v55  ;;  %v979_v57 = vpop.f32.mrb[19].mxu0 }
 0x887   :  { %858 = vst [vmem:[#allocation10 + $0x8] sm:$0xff] %v854_v56 }
 0x888   :  { %1188 = shalt.err (!%p1185_p0)
}
 0x889   :  { %s1189_s14 = scalar_lea.hbm %s1649_s5, 256 }
 0x88a   :  { %p1190_p1 = scmp.ne.s32.totalorder %s1649_s5, %s1189_s14  ;;  %p1193_p2 = scmp.lt.u32.totalorder %s1189_s14, %s1649_s5 }
 0x88c   :  { %p1195_p3 = pnand %p1193_p2, %p1190_p1 }
 0x88e   :  { %1198 = shalt.err (!%p1195_p3)
}
 0x88f   :  { %870 = dma.vmem_to_hbm [thread:$0]  %s865_s11, 256, %s1649_s5, [#allocation6], %s1206_s28, %s1206_s28, %s1207_s29  }
 0x890   :  { %1203 = dma.done.wait [#allocation6], 256  }
 0x891   :  { %1204 = vsyncadd [#allocation6], 4294967040 }
 0x892   :  { %874 = vsyncpa [#allocation5], 1 }
 0x893   :  { %875 = vsyncpa [#allocation8], 1 }
 0x894   :  { %876 = vsyncpa [#allocation6], 1 }

</bundles_post_ra>
